<compile_context>
chip_gen: v6e
topology: v6e:2x2x1
jax: 0.10.0
libtpu: 0.0.40
codegen_flags: <defaults>
</compile_context>

<pallas_src>
import functools

import jax
import jax.numpy as jnp
from jax.experimental import pallas as pl
from jax.experimental.pallas import tpu as pltpu

LANE = 128       # every layer's *output* (N) dim is padded to this -> lane-dense
FC2_SIZE = 64    # hidden sizes from the PyTorch module
FC1_SIZE = 32


def _round_up(n, m):
    return ((n + m - 1) // m) * m


def dqn_kernel(x_ref, w_ref, b_ref, o_ref, *, s, h1, h2):
    """One batch tile of the 3-layer MLP.

    x_ref : (TB, s)       float32   activation tile (true feature width, no lane pad)
    w_ref : (R, 3*128)    bfloat16  packed weight slab [w1 | w2 | w3], K unpadded
    b_ref : (1, 3*128)    float32   packed bias slab   [b1 | b2 | b3]
    o_ref : (TB, 128)     bf16/f32  lane-dense logits (cols >= action_space are 0)
    """
    x = x_ref[...].astype(jnp.bfloat16)                        # bf16 cast in-kernel (VPU)

    # fc1: (TB, s) @ (s, 128) -> f32 accumulate, bias + ReLU
    a1 = jnp.dot(x, w_ref[:s, 0:LANE], preferred_element_type=jnp.float32)
    a1 = jnp.maximum(a1 + b_ref[:, 0:LANE], 0.0)
    a1 = a1[:, :h1].astype(jnp.bfloat16)                       # drop zero lanes; K stays unpadded

    # fc2: (TB, 64) @ (64, 128)
    a2 = jnp.dot(a1, w_ref[:h1, LANE:2 * LANE], preferred_element_type=jnp.float32)
    a2 = jnp.maximum(a2 + b_ref[:, LANE:2 * LANE], 0.0)
    a2 = a2[:, :h2].astype(jnp.bfloat16)

    # fc3 (logits, no activation): (TB, 32) @ (32, 128)
    logits = jnp.dot(a2, w_ref[:h2, 2 * LANE:3 * LANE], preferred_element_type=jnp.float32)
    o_ref[...] = (logits + b_ref[:, 2 * LANE:3 * LANE]).astype(o_ref.dtype)


@functools.partial(
    jax.jit,
    static_argnames=("action_space", "fc2_size", "fc1_size", "tb_max", "out_dtype"))
def dqn_forward(x, params, *, action_space, fc2_size=FC2_SIZE, fc1_size=FC1_SIZE,
                tb_max=2048, out_dtype=jnp.bfloat16):
    """x: (B, state_space) float32. params: packed slabs from prepare_params."""
    w, b = params["w"], params["b"]
    B, S = x.shape

    # Batch tile: multiple of 16 (bf16 sublane packing), capped at tb_max.
    TB = min(tb_max, _round_up(B, 16))
    # v7x megacore: if the batch is big but would collapse to one grid step,
    # split into ~2 tiles so the "parallel" axis can shard across both cores.
    if B > 256 and B <= TB:
        TB = _round_up((B + 1) // 2, 16)
    B_pad = _round_up(B, TB)

    # Pad batch *rows* only (true feature width) -- no lane-padded x copy.
    x_p = x if B_pad == B else jnp.pad(x, ((0, B_pad - B), (0, 0)))

    grid = (B_pad // TB,)

    cost = pl.CostEstimate(
        flops=2 * B_pad * LANE * (S + fc2_size + fc1_size),
        transcendentals=0,
        bytes_accessed=(x_p.size * x_p.dtype.itemsize
                        + B_pad * LANE * jnp.dtype(out_dtype).itemsize
                        + w.size * w.dtype.itemsize
                        + b.size * b.dtype.itemsize),
    )

    kernel = functools.partial(dqn_kernel, s=S, h1=fc2_size, h2=fc1_size)

    out_p = pl.pallas_call(
        kernel,
        out_shape=jax.ShapeDtypeStruct((B_pad, LANE), out_dtype),
        grid=grid,
        in_specs=[
            pl.BlockSpec((TB, S), lambda i: (i, 0)),   # x: walks the batch, true width
            pl.BlockSpec(w.shape, lambda i: (0, 0)),   # weight slab: VMEM-resident
            pl.BlockSpec(b.shape, lambda i: (0, 0)),   # bias slab:   VMEM-resident
        ],
        out_specs=pl.BlockSpec((TB, LANE), lambda i: (i, 0)),
        compiler_params=pltpu.CompilerParams(
            dimension_semantics=("parallel",),
        ),
        cost_estimate=cost,
    )(x_p, w, b)

    # Single fused slice: true batch rows, true action columns.
    return out_p[:B, :action_space]


def init_dqn_params(key, state_space, action_space, fc2_size=FC2_SIZE, fc1_size=FC1_SIZE):
    """Deterministic synthetic init mimicking nn.Linear's default uniform range.

    Returns weights already transposed to (in, out), at their true shapes.
    """
    ks = jax.random.split(key, 6)

    def lin(kw, kb, fan_in, fan_out):
        bound = 1.0 / jnp.sqrt(jnp.float32(fan_in))
        w = jax.random.uniform(kw, (fan_in, fan_out), jnp.float32, -bound, bound)
        b = jax.random.uniform(kb, (1, fan_out), jnp.float32, -bound, bound)
        return w, b

    w1, b1 = lin(ks[0], ks[1], state_space, fc2_size)
    w2, b2 = lin(ks[2], ks[3], fc2_size, fc1_size)
    w3, b3 = lin(ks[4], ks[5], fc1_size, action_space)
    return {"w1": w1, "b1": b1, "w2": w2, "b2": b2, "w3": w3, "b3": b3}


def prepare_params(p):
    """Pack the six Linear params into two VMEM-resident slabs.

    Weight slab (R, 3*128) bf16:   [:S,  0:64+]    = w1   (K unpadded, N padded to 128)
                                   [:64, 128:160+] = w2
                                   [:32, 256:256+A]= w3
    Bias slab   (1, 3*128) f32 laid out the same way along lanes.
    Zero padding is exact: padded output lanes stay 0 through bias+ReLU and the
    final [:, :action_space] slice recovers the true logits.
    """
    w1, b1, w2, b2, w3, b3 = (p["w1"], p["b1"], p["w2"], p["b2"], p["w3"], p["b3"])
    S, H1 = w1.shape
    H2 = w2.shape[1]
    A = w3.shape[1]
    assert H1 <= LANE and H2 <= LANE and A <= LANE

    R = _round_up(max(S, H1, H2), 8)
    w = jnp.zeros((R, 3 * LANE), jnp.bfloat16)
    w = w.at[:S, 0:H1].set(w1.astype(jnp.bfloat16))
    w = w.at[:H1, LANE:LANE + H2].set(w2.astype(jnp.bfloat16))
    w = w.at[:H2, 2 * LANE:2 * LANE + A].set(w3.astype(jnp.bfloat16))

    b = jnp.zeros((1, 3 * LANE), jnp.float32)
    b = b.at[:, 0:H1].set(b1)
    b = b.at[:, LANE:LANE + H2].set(b2)
    b = b.at[:, 2 * LANE:2 * LANE + A].set(b3)
    return {"w": w, "b": b}


def dqn_reference(x, p):
    """Pure-JAX f32 reference at true (unpadded) shapes."""
    h1 = jnp.maximum(x @ p["w1"] + p["b1"], 0.0)
    h2 = jnp.maximum(h1 @ p["w2"] + p["b2"], 0.0)
    return h2 @ p["w3"] + p["b3"]


if __name__ == "__main__":
    key = jax.random.PRNGKey(0)
    k_param, k_x = jax.random.split(key)

    batch = 8
    state_space = 32
    action_space = 16

    params = init_dqn_params(k_param, state_space, action_space)
    packed = prepare_params(params)
    x = jax.random.normal(k_x, (batch, state_space), jnp.float32)

    out = dqn_forward(x, packed, action_space=action_space)
    out = jax.block_until_ready(out)
    ref = dqn_reference(x, params)

    assert out.shape == (batch, action_space)
    # bf16 matmul operands + bf16 logits -> loosened tolerance vs f32 reference.
    assert jnp.allclose(out.astype(jnp.float32), ref, atol=3e-2, rtol=3e-2), "mismatch (bf16 out)"

    # f32-output path (for consumers that need tighter Q-values) also works.
    out_f32 = jax.block_until_ready(
        dqn_forward(x, packed, action_space=action_space, out_dtype=jnp.float32))
    assert out_f32.shape == (batch, action_space)
    assert jnp.allclose(out_f32, ref, atol=2e-2, rtol=2e-2), "mismatch (f32 out)"

    print("KERNEL_OK")
</pallas_src>

<mosaic_0001>
module attributes {stable_mosaic.version = 11 : i64} {
  func.func @dqn_kernel(%arg0: i32, %arg1: memref<16x32xf32, #tpu.memory_space<vmem>>, %arg2: memref<64x384xbf16, #tpu.memory_space<vmem>>, %arg3: memref<1x384xf32, #tpu.memory_space<vmem>>, %arg4: memref<16x128xbf16, #tpu.memory_space<vmem>>) attributes {dimension_semantics = [#tpu.dimension_semantics<parallel>], iteration_bounds = array<i64: 1>, scalar_prefetch = 0 : i64, scratch_operands = 0 : i64, tpu.core_type = #tpu.core_type<tc>, window_params = [{transform_indices = @transform_0, window_bounds = array<i64: 16, 32>}, {pipeline_mode = #tpu.pipeline_mode<synchronous>, transform_indices = @transform_1, window_bounds = array<i64: 64, 384>}, {pipeline_mode = #tpu.pipeline_mode<synchronous>, transform_indices = @transform_2, window_bounds = array<i64: 1, 384>}, {transform_indices = @transform_3, window_bounds = array<i64: 16, 128>}]} {
    %c0 = arith.constant 0 : index
    %c0_0 = arith.constant 0 : index
    %0 = vector.load %arg1[%c0, %c0_0] : memref<16x32xf32, #tpu.memory_space<vmem>>, vector<16x32xf32>
    %1 = arith.truncf %0 : vector<16x32xf32> to vector<16x32xbf16>
    %c0_1 = arith.constant 0 : index
    %c0_2 = arith.constant 0 : index
    %2 = vector.load %arg2[%c0_1, %c0_2] : memref<64x384xbf16, #tpu.memory_space<vmem>>, vector<32x128xbf16>
    %cst = arith.constant dense<0.000000e+00> : vector<16x128xf32>
    %3 = tpu.matmul %1, %2, %cst {dimension_numbers = #tpu.dot_dimension_numbers<[1], [0], [0], [1], [0, 0, 1, 1], [], []>} : vector<16x32xbf16>, vector<32x128xbf16>, vector<16x128xf32> -> vector<16x128xf32>
    %c0_3 = arith.constant 0 : index
    %c0_4 = arith.constant 0 : index
    %4 = vector.load %arg3[%c0_3, %c0_4] : memref<1x384xf32, #tpu.memory_space<vmem>>, vector<1x128xf32>
    %5 = vector.broadcast %4 : vector<1x128xf32> to vector<16x128xf32>
    %6 = arith.addf %3, %5 : vector<16x128xf32>
    %cst_5 = arith.constant 0.000000e+00 : f32
    %7 = vector.broadcast %cst_5 : f32 to vector<16x128xf32>
    %8 = arith.maximumf %6, %7 : vector<16x128xf32>
    %9 = vector.extract_strided_slice %8 {offsets = [0, 0], sizes = [16, 64], strides = [1, 1]} : vector<16x128xf32> to vector<16x64xf32>
    %10 = arith.truncf %9 : vector<16x64xf32> to vector<16x64xbf16>
    %c0_6 = arith.constant 0 : index
    %c128 = arith.constant 128 : index
    %11 = vector.load %arg2[%c0_6, %c128] : memref<64x384xbf16, #tpu.memory_space<vmem>>, vector<64x128xbf16>
    %cst_7 = arith.constant dense<0.000000e+00> : vector<16x128xf32>
    %12 = tpu.matmul %10, %11, %cst_7 {dimension_numbers = #tpu.dot_dimension_numbers<[1], [0], [0], [1], [0, 0, 1, 1], [], []>} : vector<16x64xbf16>, vector<64x128xbf16>, vector<16x128xf32> -> vector<16x128xf32>
    %c0_8 = arith.constant 0 : index
    %c128_9 = arith.constant 128 : index
    %13 = vector.load %arg3[%c0_8, %c128_9] : memref<1x384xf32, #tpu.memory_space<vmem>>, vector<1x128xf32>
    %14 = vector.broadcast %13 : vector<1x128xf32> to vector<16x128xf32>
    %15 = arith.addf %12, %14 : vector<16x128xf32>
    %cst_10 = arith.constant 0.000000e+00 : f32
    %16 = vector.broadcast %cst_10 : f32 to vector<16x128xf32>
    %17 = arith.maximumf %15, %16 : vector<16x128xf32>
    %18 = vector.extract_strided_slice %17 {offsets = [0, 0], sizes = [16, 32], strides = [1, 1]} : vector<16x128xf32> to vector<16x32xf32>
    %19 = arith.truncf %18 : vector<16x32xf32> to vector<16x32xbf16>
    %c0_11 = arith.constant 0 : index
    %c256 = arith.constant 256 : index
    %20 = vector.load %arg2[%c0_11, %c256] : memref<64x384xbf16, #tpu.memory_space<vmem>>, vector<32x128xbf16>
    %cst_12 = arith.constant dense<0.000000e+00> : vector<16x128xf32>
    %21 = tpu.matmul %19, %20, %cst_12 {dimension_numbers = #tpu.dot_dimension_numbers<[1], [0], [0], [1], [0, 0, 1, 1], [], []>} : vector<16x32xbf16>, vector<32x128xbf16>, vector<16x128xf32> -> vector<16x128xf32>
    %c0_13 = arith.constant 0 : index
    %c256_14 = arith.constant 256 : index
    %22 = vector.load %arg3[%c0_13, %c256_14] : memref<1x384xf32, #tpu.memory_space<vmem>>, vector<1x128xf32>
    %23 = vector.broadcast %22 : vector<1x128xf32> to vector<16x128xf32>
    %24 = arith.addf %21, %23 : vector<16x128xf32>
    %25 = arith.truncf %24 : vector<16x128xf32> to vector<16x128xbf16>
    %c0_15 = arith.constant 0 : index
    %c0_16 = arith.constant 0 : index
    %26 = vector.load %arg4[%c0_15, %c0_16] : memref<16x128xbf16, #tpu.memory_space<vmem>>, vector<16x128xbf16>
    tpu.vector_store %arg4[%c0_15, %c0_16], %25 {strides = array<i32>} : memref<16x128xbf16, #tpu.memory_space<vmem>>, vector<16x128xbf16>,
    return
  }
  func.func @transform_0(%arg0: i32) -> (i32, i32) {
    %c0_i32 = arith.constant 0 : i32
    %c0_i32_0 = arith.constant 0 : i32
    return %arg0, %c0_i32 : i32, i32
  }
  func.func @transform_1(%arg0: i32) -> (i32, i32) {
    %c0_i32 = arith.constant 0 : i32
    %c0_i32_0 = arith.constant 0 : i32
    %c0_i32_1 = arith.constant 0 : i32
    return %c0_i32, %c0_i32_0 : i32, i32
  }
  func.func @transform_2(%arg0: i32) -> (i32, i32) {
    %c0_i32 = arith.constant 0 : i32
    %c0_i32_0 = arith.constant 0 : i32
    %c0_i32_1 = arith.constant 0 : i32
    return %c0_i32, %c0_i32_0 : i32, i32
  }
  func.func @transform_3(%arg0: i32) -> (i32, i32) {
    %c0_i32 = arith.constant 0 : i32
    %c0_i32_0 = arith.constant 0 : i32
    return %arg0, %c0_i32 : i32, i32
  }
}

</mosaic_0001>

<bundles_post_ra>
// kernel: dqn_forward.1
= control target key start
LH: loop header
LB: loop body
LE: loop exit
PB: predicated region body
PF: predicated region fallthrough
CT: control target
= control target key end

     0   :  { %8 = vsyncpa [#allocation3], 0  ;;  %s369_s12 = smov [#allocation2]   ;;  %s420_s0 = inlined_call_operand.vmem [shape: f32[16,32], index: 0, kind: input, shape index: {}]   ;;  %s421_s1 = inlined_call_operand.hbm [shape: bf16[64,384], index: 1, kind: input, shape index: {}]   ;;  %s422_s2 = inlined_call_operand.vmem [shape: f32[1,384], index: 2, kind: input, shape index: {}]   ;;  %s423_s3 = inlined_call_operand.vmem [shape: bf16[16,128], index: 3, kind: output, shape index: {}]  }
   0x1   :  { %s16_s13 = sshll.u32 %s369_s12, 4  ;;  %s17_s13 = int_to_ptr.vmem [resolvable:$true] %s16_s13 }
   0x2   :  { %s355_s14 = scalar_lea.vmem %s17_s13, 1536  ;;  %p360_p1 = scmp.lt.s32.totalorder %s17_s13, %s17_s13 }
   0x3   :  { %p356_p0 = scmp.ne.s32.totalorder %s17_s13, %s355_s14  ;;  %p361_p2 = scmp.lt.s32.totalorder %s355_s14, %s355_s14 }
   0x5   :  { %p362_p3 = por %p361_p2, %p360_p1 }
   0x7   :  { %p363_p4 = pnand %p362_p3, %p356_p0 }
   0x9   :  { %366 = shalt.err (!%p363_p4)
}
   0xa   :  { %s370_s15 = smov 192   ;;  %s371_s16 = smov 12  }
   0xb   :  { %22 = dma.hbm_to_vmem [thread:$0]  %s421_s1, 1536, %s17_s13, [#allocation3], %s370_s15, %s370_s15, %s371_s16  }
   0xc   :  { %367 = dma.done.wait [#allocation3], 1536  }
   0xd   :  { %368 = vsyncadd [#allocation3], 4294965760  ;;  %v372_v0 = vmov 0.0   ;;  %vm373_vm0 = vmmov 0   ;;  %v339_v1 = vld [vmem:[#allocation2 + $0x18] ss:$12 sps:$4 sm:$0xff]  }
   0xe   :  { %306 = vmatprep.subr.bf16.mxu0 %v372_v0  ;;  %310 = vmatprep.mubr.msk.bf16.mxu0 %vm373_vm0, %v372_v0  ;;  %v340_v2 = vld [vmem:[#allocation2] ss:$12 sps:$4 sm:$0xff]   ;;  %vm55_vm1 = vcmask 261120   ;;  %v343_v8 = vld [vmem:[#allocation2 + $0x1c] ss:$12 sps:$4 sm:$0xff]   ;;  %vm142_vm2 = vcmask 523264  }
   0xf   :  { %314 = vmatprep.subr.bf16.mxu1 %v372_v0  ;;  %322 = vmatprep.mubr.msk.bf16.mxu1 %vm373_vm0, %v372_v0  ;;  %v29_v3 = vld [vmem:[%s420_s0] sm:$0xff]  ;;  %v30_v4 = vld [vmem:[%s420_s0 + $0x8] sm:$0xff] }
  0x10   :  { %307 = vmatpush3.bf16.msra.mxu0 %v339_v1  ;;  %v341_v5 = vld [vmem:[#allocation2 + $0x4c] ss:$12 sps:$4 sm:$0xff]   ;;  %v31_v6 = vpack.c.bf16 %v30_v4, %v29_v3  ;;  %v342_v7 = vld [vmem:[#allocation2 + $0x34] ss:$12 sps:$4 sm:$0xff]   ;;  %v344_v9 = vld [vmem:[#allocation2 + $0x4] ss:$12 sps:$4 sm:$0xff]  }
  0x11   :  { %308 = vmatprep.subr.bf16.mxu0 %v372_v0  ;;  %315 = vmatpush3.bf16.msra.mxu1 %v341_v5  ;;  %v272_v10 = vld [vmem:[%s422_s2] ss:$0 sm:$0xff]  ;;  %v346_v21 = vld [vmem:[#allocation2 + $0x8] ss:$12 sps:$4 sm:$0xff]   ;;  %v276_v22 = vld [vmem:[%s422_s2 + $0x1] ss:$0 sm:$0xff] }
  0x12   :  { %316 = vmatprep.subr.bf16.mxu1 %v372_v0  ;;  %v345_v20 = vld [vmem:[#allocation2 + $0x20] ss:$12 sps:$4 sm:$0xff]  }
  0x13   :  { %v282_v33 = vld [vmem:[%s422_s2 + $0x2] ss:$0 sm:$0xff] }
  0x14   :  { %309 = vmatpush3.bf16.msra.mxu0 %v340_v2 }
  0x15   :  { %326 = vmatprep.subr.bf16.mxu0 %v372_v0  ;;  %317 = vmatpush3.bf16.msra.mxu1 %v342_v7 }
  0x16   :  { %318 = vmatprep.subr.bf16.mxu1 %v372_v0 }
  0x17   :  { %311 = vmatmul.mubr.msk.bf16.vlgmr.msra.gmra.mxu0 %vm55_vm1, %v31_v6 }
  0x18   :  { %330 = vmatprep.mubr.msk.bf16.mxu0 %vm373_vm0, %v372_v0  ;;  %327 = vmatpush3.bf16.msra.mxu0 %v345_v20 }
  0x19   :  { %319 = vmatpush3.bf16.msra.mxu1 %v343_v8  ;;  %328 = vmatprep.subr.bf16.mxu0 %v372_v0 }
  0x1a   :  { %320 = vmatprep.subr.bf16.mxu1 %v372_v0 }
  0x1c   :  { %329 = vmatpush3.bf16.msra.mxu0 %v346_v21 }
  0x1d   :  { %321 = vmatpush3.bf16.msra.mxu1 %v344_v9 }
  0xd7   :  { %v93_v11 = vpop.f32.mrf.mxu0 }
  0xd8   :  { %v94_v13 = vadd.f32 %v272_v10, %v93_v11 }
  0xd9   :  { %v312_v12 = vpop.f32.mrf.mxu0 }
  0xda   :  { %v100_v17 = vmax.f32 %v94_v13, 0.0 }
  0xdb   :  { %v96_v14 = vpop.f32.mrf.mxu0 }
  0xdc   :  { %v97_v15 = vadd.f32 %v272_v10, %v96_v14 }
  0xdd   :  { %v313_v16 = vpop.f32.mrf.mxu0 }
  0xde   :  { %v101_v18 = vmax.f32 %v97_v15, 0.0 }
  0xe0   :  { %v102_v19 = vpack.c.bf16 %v101_v18, %v100_v17 }
  0xe2   :  { %323 = vmatmul.mubr.msk.bf16.vlgmr.msra.gmra.mxu1 %vm142_vm2, %v102_v19 }
 0x1a2   :  { %v180_v23 = vpop.f32.mrf.mxu1 }
 0x1a3   :  { %v181_v25 = vadd.f32 %v276_v22, %v180_v23 }
 0x1a4   :  { %v324_v24 = vpop.f32.mrf.mxu1 }
 0x1a5   :  { %v187_v29 = vmax.f32 %v181_v25, 0.0 }
 0x1a6   :  { %v183_v26 = vpop.f32.mrf.mxu1 }
 0x1a7   :  { %v184_v27 = vadd.f32 %v276_v22, %v183_v26 }
 0x1a8   :  { %v325_v28 = vpop.f32.mrf.mxu1 }
 0x1a9   :  { %v188_v30 = vmax.f32 %v184_v27, 0.0 }
 0x1ab   :  { %v189_v31 = vpack.c.bf16 %v188_v30, %v187_v29 }
 0x1ad   :  { %331 = vmatmul.mubr.msk.bf16.vlgmr.msra.gmra.mxu0 %vm55_vm1, %v189_v31 }
 0x26d   :  { %v250_v32 = vpop.f32.mrf.mxu0 }
 0x26e   :  { %v251_v36 = vadd.f32 %v282_v33, %v250_v32 }
 0x26f   :  { %v332_v34 = vpop.f32.mrf.mxu0 }
 0x271   :  { %v253_v35 = vpop.f32.mrf.mxu0 }
 0x272   :  { %v254_v37 = vadd.f32 %v282_v33, %v253_v35 }
 0x273   :  { %v333_v38 = vpop.f32.mrf.mxu0 }
 0x274   :  { %v293_v39 = vpack.c.bf16 %v254_v37, %v251_v36 }
 0x276   :  { %294 = vst [vmem:[%s423_s3] sm:$0xff] %v293_v39  }
 0x277   :  { %271 = vsyncpa [#allocation3], 1 }

</bundles_post_ra>
